<compile_context>
chip_gen: v6e
topology: v6e:2x2x1
jax: 0.10.0
libtpu: 0.0.40
codegen_flags: <defaults>
</compile_context>

<pallas_src>
import functools

import jax
import jax.numpy as jnp
from jax import lax
from jax.experimental import pallas as pl
from jax.experimental.pallas import tpu as pltpu

LN_EPS = 1e-5


def _layernorm_fused(h, gamma, beta):
    """Single-pass LayerNorm: E[h] and E[h^2] in one sweep (f32).

    h is always a fresh f32-accumulated matmul output here (mean ~0 at these
    scales), so the E[h^2] - mu^2 cancellation is benign; the full-f32 two-pass
    reference below remains the correctness anchor.
    """
    mu = jnp.mean(h, axis=-1, keepdims=True)
    msq = jnp.mean(h * h, axis=-1, keepdims=True)
    var = jnp.maximum(msq - mu * mu, 0.0)   # keep clamp: padded rows hit var==0
    return (h - mu) * lax.rsqrt(var + LN_EPS) * gamma + beta


def backbone_kernel(res_num,
                    x_ref,        # (tm, in_dim)             bf16
                    wp_ref,       # (in_dim, emb)            bf16
                    pvec_ref,     # (3, emb)  [b,gamma,beta] f32
                    wres_ref,     # (res_num, 2, emb, emb)   bf16
                    rvec_ref,     # (res_num, 6, emb)        f32
                    o_ref):       # (tm, emb)
    pv = pvec_ref[...]                       # (3, emb) f32
    bp, gp, betap = pv[0:1, :], pv[1:2, :], pv[2:3, :]

    # project: Linear -> LayerNorm -> ReLU   (bf16 MXU, f32 accumulate / LN)
    h = jnp.dot(x_ref[...], wp_ref[...], preferred_element_type=jnp.float32) + bp
    h = jnp.maximum(_layernorm_fused(h, gp, betap), 0.0).astype(jnp.bfloat16)

    # resnet: res_num x ResFCBlock2 (small static count -> unrolled)
    for r in range(res_num):
        rv = rvec_ref[r]                     # (6, emb) f32
        b1, g1, be1 = rv[0:1, :], rv[1:2, :], rv[2:3, :]
        b2, g2, be2 = rv[3:4, :], rv[4:5, :], rv[5:6, :]
        w1 = wres_ref[r, 0]                  # (emb, emb) bf16
        w2 = wres_ref[r, 1]

        resid = h                            # bf16: halves live activation bytes
        t = jnp.dot(h, w1, preferred_element_type=jnp.float32) + b1
        t = jnp.maximum(_layernorm_fused(t, g1, be1), 0.0).astype(jnp.bfloat16)
        t = jnp.dot(t, w2, preferred_element_type=jnp.float32) + b2
        t = _layernorm_fused(t, g2, be2)
        h = jnp.maximum(t + resid.astype(jnp.float32), 0.0).astype(jnp.bfloat16)

    o_ref[...] = h.astype(o_ref.dtype)


def prepare_params(params):
    """One-time packing of f32 module weights into kernel-ready slabs.

    Call ONCE (outside the training/inference step); backbone_forward consumes
    the result so no weight repacking happens per call.
    """
    wp_bf = params["wp"].astype(jnp.bfloat16)                          # (K, emb)
    wres = jnp.stack([params["w1"], params["w2"]], axis=1)             # (R,2,emb,emb)
    wres = wres.astype(jnp.bfloat16)
    pvec = jnp.concatenate([params["bp"], params["gp"], params["betap"]],
                           axis=0)                                     # (3, emb)
    rvec = jnp.concatenate([params["b1"], params["g1"], params["be1"],
                            params["b2"], params["g2"], params["be2"]],
                           axis=1)                                     # (R, 6, emb)
    return {"wp_bf": wp_bf, "pvec": pvec, "wres": wres, "rvec": rvec}


def backbone_forward(x, packed, *, tm=None, out_dtype=jnp.float32):
    """x: (B, input_dim). packed: output of prepare_params (already bf16/packed)."""
    B, in_dim = x.shape
    wp_bf, pvec, wres, rvec = (packed["wp_bf"], packed["pvec"],
                               packed["wres"], packed["rvec"])
    emb = wp_bf.shape[1]
    res_num = wres.shape[0]

    # DMA x as bf16 (cast fused here, no in-kernel astype).  No K pad: a
    # (tm, in_dim) block is legal because in_dim equals the full array dim.
    x_bf = x.astype(jnp.bfloat16)

    # Batch tile: single grid step up to B=256 (latency-bound regime); larger B
    # uses 256-row tiles so the 256-wide MXU (v6e/v7x) gets enough M and the
    # per-step overhead amortizes.  B > 256 also gives >= 2 "parallel" steps so
    # both v7x TensorCores engage.
    if tm is None:
        tm = B if B <= 256 else 256
    b_pad = (-B) % tm
    if b_pad:
        x_bf = jnp.pad(x_bf, ((0, b_pad), (0, 0)))
    Bp = B + b_pad
    grid = (Bp // tm,)

    out_itemsize = jnp.dtype(out_dtype).itemsize

    # Explicit VMEM budget (grid-invariant weights are double-buffered by the
    # default pipeliner; harmless at these sizes).
    # TODO(synk): for v7x scaled configs (res_num*emb^2 bf16 weights ~32 MiB),
    # mark the four grid-invariant weight specs pipeline_mode=pl.Buffered(1) or
    # stream one residual block per 'arbitrary' grid step to fit 64 MiB VMEM.
    weight_bytes = (wp_bf.size + wres.size) * 2 + (pvec.size + rvec.size) * 4
    io_bytes = tm * in_dim * 2 + tm * emb * out_itemsize
    act_bytes = tm * emb * (4 + 4 + 2 + 2) * 2     # t/LN temps f32, h/resid bf16, slack
    vmem_limit = 2 * weight_bytes + 2 * io_bytes + act_bytes + (2 << 20)
    vmem_limit = int(min(max(vmem_limit, 4 << 20), 48 << 20))

    kern = functools.partial(backbone_kernel, res_num)

    def full(shape):
        return pl.BlockSpec(shape, lambda i: (0,) * len(shape))

    grid_spec = pl.GridSpec(
        grid=grid,
        in_specs=[
            pl.BlockSpec((tm, in_dim), lambda i: (i, 0)),     # x rows (bf16)
            full((in_dim, emb)),                              # project W (bf16)
            full((3, emb)),                                   # project b/gamma/beta
            full((res_num, 2, emb, emb)),                     # res W1,W2 (bf16)
            full((res_num, 6, emb)),                          # res b/gamma/beta x2
        ],
        out_specs=pl.BlockSpec((tm, emb), lambda i: (i, 0)),
    )

    cost = pl.CostEstimate(
        flops=2 * Bp * (in_dim * emb + 2 * res_num * emb * emb),
        transcendentals=Bp * (1 + 2 * res_num),               # one rsqrt per LN row
        bytes_accessed=int(x_bf.size * 2 + weight_bytes + Bp * emb * out_itemsize),
    )

    out = pl.pallas_call(
        kern,
        out_shape=jax.ShapeDtypeStruct((Bp, emb), out_dtype),
        grid_spec=grid_spec,
        cost_estimate=cost,
        compiler_params=pltpu.CompilerParams(
            dimension_semantics=("parallel",),
            vmem_limit_bytes=vmem_limit),
    )(x_bf, wp_bf, pvec, wres, rvec)

    return out[:B] if b_pad else out


# ----------------------------- references -----------------------------------

def backbone_reference_mixed(x, params):
    """Pure-JAX reference mirroring the kernel's exact precision choices:
    bf16 MXU inputs, bf16 inter-block activations/residual, f32 fused LN."""
    bf = lambda a: a.astype(jnp.bfloat16)

    def dot_bf(a_bf, w):
        return jnp.dot(a_bf, bf(w), preferred_element_type=jnp.float32)

    h = dot_bf(bf(x), params["wp"]) + params["bp"]
    h = bf(jnp.maximum(_layernorm_fused(h, params["gp"], params["betap"]), 0.0))
    res_num = params["w1"].shape[0]
    for r in range(res_num):
        resid = h
        t = dot_bf(h, params["w1"][r]) + params["b1"][r]
        t = bf(jnp.maximum(_layernorm_fused(t, params["g1"][r], params["be1"][r]), 0.0))
        t = dot_bf(t, params["w2"][r]) + params["b2"][r]
        t = _layernorm_fused(t, params["g2"][r], params["be2"][r])
        h = bf(jnp.maximum(t + resid.astype(jnp.float32), 0.0))
    return h.astype(jnp.float32)


def backbone_reference_f32(x, params):
    """Full-precision reference (two-pass LN) of the original module."""
    def ln(h, gamma, beta):
        mu = jnp.mean(h, axis=-1, keepdims=True)
        var = jnp.mean((h - mu) ** 2, axis=-1, keepdims=True)
        return (h - mu) * lax.rsqrt(var + LN_EPS) * gamma + beta

    h = x @ params["wp"] + params["bp"]
    h = jnp.maximum(ln(h, params["gp"], params["betap"]), 0.0)
    res_num = params["w1"].shape[0]
    for r in range(res_num):
        resid = h
        t = h @ params["w1"][r] + params["b1"][r]
        t = jnp.maximum(ln(t, params["g1"][r], params["be1"][r]), 0.0)
        t = t @ params["w2"][r] + params["b2"][r]
        t = ln(t, params["g2"][r], params["be2"][r])
        h = jnp.maximum(t + resid, 0.0)
    return h


def init_params(key, in_dim, emb, res_num):
    ks = jax.random.split(key, 6)
    s_in = 1.0 / jnp.sqrt(in_dim)
    s_emb = 1.0 / jnp.sqrt(emb)
    # Weights stored as (in, out) == torch W.T ; LN affine init like nn.LayerNorm.
    return {
        "wp": jax.random.uniform(ks[0], (in_dim, emb), jnp.float32, -s_in, s_in),
        "bp": jax.random.uniform(ks[1], (1, emb), jnp.float32, -s_in, s_in),
        "gp": jnp.ones((1, emb), jnp.float32),
        "betap": jnp.zeros((1, emb), jnp.float32),
        "w1": jax.random.uniform(ks[2], (res_num, emb, emb), jnp.float32, -s_emb, s_emb),
        "b1": jax.random.uniform(ks[3], (res_num, 1, emb), jnp.float32, -s_emb, s_emb),
        "g1": jnp.ones((res_num, 1, emb), jnp.float32),
        "be1": jnp.zeros((res_num, 1, emb), jnp.float32),
        "w2": jax.random.uniform(ks[4], (res_num, emb, emb), jnp.float32, -s_emb, s_emb),
        "b2": jax.random.uniform(ks[5], (res_num, 1, emb), jnp.float32, -s_emb, s_emb),
        "g2": jnp.ones((res_num, 1, emb), jnp.float32),
        "be2": jnp.zeros((res_num, 1, emb), jnp.float32),
    }


if __name__ == "__main__":
    # cfg.model.backbone: project.input_dim=64, embedding_dim=128, res_num=2
    B, IN_DIM, EMB, RES_NUM = 16, 64, 128, 2

    key = jax.random.PRNGKey(0)
    kx, kp = jax.random.split(key)
    x = jax.random.normal(kx, (B, IN_DIM), jnp.float32)
    params = init_params(kp, IN_DIM, EMB, RES_NUM)

    # One-time weight packing (kept out of the per-step hot path).
    packed = jax.block_until_ready(prepare_params(params))

    # Hot path: a single jitted call wrapping the pallas kernel.
    fwd = jax.jit(backbone_forward)
    out = jax.block_until_ready(fwd(x, packed))
    assert out.shape == (B, EMB)

    # Exact-semantics check: reference that mirrors the kernel's precision.
    ref_mixed = backbone_reference_mixed(x, params)
    assert jnp.allclose(out, ref_mixed, atol=1e-3, rtol=1e-3), \
        "mismatch vs mixed-precision reference"

    # Anchor: full-f32 two-pass-LN semantics of the original module
    # (bounds the accumulated bf16 error; tightened from 0.25 -> 0.1).
    ref_f32 = backbone_reference_f32(x, params)
    max_diff = float(jnp.max(jnp.abs(out - ref_f32)))
    assert max_diff < 0.1, f"bf16 deviation too large vs f32 reference: {max_diff}"

    print("KERNEL_OK")
</pallas_src>

<mosaic_0001>
module attributes {stable_mosaic.version = 11 : i64} {
  func.func @backbone_kernel(%arg0: i32, %arg1: memref<16x64xbf16, #tpu.memory_space<vmem>>, %arg2: memref<64x128xbf16, #tpu.memory_space<vmem>>, %arg3: memref<3x128xf32, #tpu.memory_space<vmem>>, %arg4: memref<2x2x128x128xbf16, #tpu.memory_space<vmem>>, %arg5: memref<2x6x128xf32, #tpu.memory_space<vmem>>, %arg6: memref<16x128xf32, #tpu.memory_space<vmem>>) attributes {dimension_semantics = [#tpu.dimension_semantics<parallel>], iteration_bounds = array<i64: 1>, scalar_prefetch = 0 : i64, scratch_operands = 0 : i64, tpu.core_type = #tpu.core_type<tc>, window_params = [{transform_indices = @transform_0, window_bounds = array<i64: 16, 64>}, {pipeline_mode = #tpu.pipeline_mode<synchronous>, transform_indices = @transform_1, window_bounds = array<i64: 64, 128>}, {pipeline_mode = #tpu.pipeline_mode<synchronous>, transform_indices = @transform_2, window_bounds = array<i64: 3, 128>}, {pipeline_mode = #tpu.pipeline_mode<synchronous>, transform_indices = @transform_3, window_bounds = array<i64: 2, 2, 128, 128>}, {pipeline_mode = #tpu.pipeline_mode<synchronous>, transform_indices = @transform_4, window_bounds = array<i64: 2, 6, 128>}, {transform_indices = @transform_5, window_bounds = array<i64: 16, 128>}]} {
    %c0 = arith.constant 0 : index
    %c0_0 = arith.constant 0 : index
    %0 = vector.load %arg3[%c0, %c0_0] : memref<3x128xf32, #tpu.memory_space<vmem>>, vector<3x128xf32>
    %1 = vector.extract_strided_slice %0 {offsets = [0, 0], sizes = [1, 128], strides = [1, 1]} : vector<3x128xf32> to vector<1x128xf32>
    %2 = vector.extract_strided_slice %0 {offsets = [1, 0], sizes = [1, 128], strides = [1, 1]} : vector<3x128xf32> to vector<1x128xf32>
    %3 = vector.extract_strided_slice %0 {offsets = [2, 0], sizes = [1, 128], strides = [1, 1]} : vector<3x128xf32> to vector<1x128xf32>
    %c0_1 = arith.constant 0 : index
    %c0_2 = arith.constant 0 : index
    %4 = vector.load %arg1[%c0_1, %c0_2] : memref<16x64xbf16, #tpu.memory_space<vmem>>, vector<16x64xbf16>
    %c0_3 = arith.constant 0 : index
    %c0_4 = arith.constant 0 : index
    %5 = vector.load %arg2[%c0_3, %c0_4] : memref<64x128xbf16, #tpu.memory_space<vmem>>, vector<64x128xbf16>
    %cst = arith.constant dense<0.000000e+00> : vector<16x128xf32>
    %6 = tpu.matmul %4, %5, %cst {dimension_numbers = #tpu.dot_dimension_numbers<[1], [0], [0], [1], [0, 0, 1, 1], [], []>} : vector<16x64xbf16>, vector<64x128xbf16>, vector<16x128xf32> -> vector<16x128xf32>
    %7 = vector.broadcast %1 : vector<1x128xf32> to vector<16x128xf32>
    %8 = arith.addf %6, %7 : vector<16x128xf32>
    %cst_5 = arith.constant dense<0.000000e+00> : vector<16xf32>
    %9 = vector.multi_reduction <add>, %8, %cst_5 [1] : vector<16x128xf32> to vector<16xf32>
    %10 = vector.shape_cast %9 : vector<16xf32> to vector<16x1xf32>
    %cst_6 = arith.constant 1.280000e+02 : f32
    %11 = vector.broadcast %cst_6 : f32 to vector<16x1xf32>
    %12 = arith.divf %10, %11 : vector<16x1xf32>
    %13 = arith.mulf %8, %8 : vector<16x128xf32>
    %cst_7 = arith.constant dense<0.000000e+00> : vector<16xf32>
    %14 = vector.multi_reduction <add>, %13, %cst_7 [1] : vector<16x128xf32> to vector<16xf32>
    %15 = vector.shape_cast %14 : vector<16xf32> to vector<16x1xf32>
    %cst_8 = arith.constant 1.280000e+02 : f32
    %16 = vector.broadcast %cst_8 : f32 to vector<16x1xf32>
    %17 = arith.divf %15, %16 : vector<16x1xf32>
    %18 = arith.mulf %12, %12 : vector<16x1xf32>
    %19 = arith.subf %17, %18 : vector<16x1xf32>
    %cst_9 = arith.constant 0.000000e+00 : f32
    %20 = vector.broadcast %cst_9 : f32 to vector<16x1xf32>
    %21 = arith.maximumf %19, %20 : vector<16x1xf32>
    %22 = vector.broadcast %12 : vector<16x1xf32> to vector<16x128xf32>
    %23 = arith.subf %8, %22 : vector<16x128xf32>
    %cst_10 = arith.constant 9.99999974E-6 : f32
    %24 = vector.broadcast %cst_10 : f32 to vector<16x1xf32>
    %25 = arith.addf %21, %24 : vector<16x1xf32>
    %26 = math.rsqrt %25 : vector<16x1xf32>
    %27 = vector.broadcast %26 : vector<16x1xf32> to vector<16x128xf32>
    %28 = arith.mulf %23, %27 : vector<16x128xf32>
    %29 = vector.broadcast %2 : vector<1x128xf32> to vector<16x128xf32>
    %30 = arith.mulf %28, %29 : vector<16x128xf32>
    %31 = vector.broadcast %3 : vector<1x128xf32> to vector<16x128xf32>
    %32 = arith.addf %30, %31 : vector<16x128xf32>
    %cst_11 = arith.constant 0.000000e+00 : f32
    %33 = vector.broadcast %cst_11 : f32 to vector<16x128xf32>
    %34 = arith.maximumf %32, %33 : vector<16x128xf32>
    %35 = arith.truncf %34 : vector<16x128xf32> to vector<16x128xbf16>
    %c0_12 = arith.constant 0 : index
    %c0_13 = arith.constant 0 : index
    %c0_14 = arith.constant 0 : index
    %36 = vector.load %arg5[%c0_12, %c0_13, %c0_14] : memref<2x6x128xf32, #tpu.memory_space<vmem>>, vector<1x6x128xf32>
    %37 = vector.shape_cast %36 : vector<1x6x128xf32> to vector<6x128xf32>
    %38 = vector.extract_strided_slice %37 {offsets = [0, 0], sizes = [1, 128], strides = [1, 1]} : vector<6x128xf32> to vector<1x128xf32>
    %39 = vector.extract_strided_slice %37 {offsets = [1, 0], sizes = [1, 128], strides = [1, 1]} : vector<6x128xf32> to vector<1x128xf32>
    %40 = vector.extract_strided_slice %37 {offsets = [2, 0], sizes = [1, 128], strides = [1, 1]} : vector<6x128xf32> to vector<1x128xf32>
    %41 = vector.extract_strided_slice %37 {offsets = [3, 0], sizes = [1, 128], strides = [1, 1]} : vector<6x128xf32> to vector<1x128xf32>
    %42 = vector.extract_strided_slice %37 {offsets = [4, 0], sizes = [1, 128], strides = [1, 1]} : vector<6x128xf32> to vector<1x128xf32>
    %43 = vector.extract_strided_slice %37 {offsets = [5, 0], sizes = [1, 128], strides = [1, 1]} : vector<6x128xf32> to vector<1x128xf32>
    %c0_15 = arith.constant 0 : index
    %c0_16 = arith.constant 0 : index
    %c0_17 = arith.constant 0 : index
    %c0_18 = arith.constant 0 : index
    %44 = vector.load %arg4[%c0_15, %c0_16, %c0_17, %c0_18] : memref<2x2x128x128xbf16, #tpu.memory_space<vmem>>, vector<1x1x128x128xbf16>
    %45 = vector.shape_cast %44 : vector<1x1x128x128xbf16> to vector<128x128xbf16>
    %c0_19 = arith.constant 0 : index
    %c1 = arith.constant 1 : index
    %c0_20 = arith.constant 0 : index
    %c0_21 = arith.constant 0 : index
    %46 = vector.load %arg4[%c0_19, %c1, %c0_20, %c0_21] : memref<2x2x128x128xbf16, #tpu.memory_space<vmem>>, vector<1x1x128x128xbf16>
    %47 = vector.shape_cast %46 : vector<1x1x128x128xbf16> to vector<128x128xbf16>
    %cst_22 = arith.constant dense<0.000000e+00> : vector<16x128xf32>
    %48 = tpu.matmul %35, %45, %cst_22 {dimension_numbers = #tpu.dot_dimension_numbers<[1], [0], [0], [1], [0, 0, 1, 1], [], []>} : vector<16x128xbf16>, vector<128x128xbf16>, vector<16x128xf32> -> vector<16x128xf32>
    %49 = vector.broadcast %38 : vector<1x128xf32> to vector<16x128xf32>
    %50 = arith.addf %48, %49 : vector<16x128xf32>
    %cst_23 = arith.constant dense<0.000000e+00> : vector<16xf32>
    %51 = vector.multi_reduction <add>, %50, %cst_23 [1] : vector<16x128xf32> to vector<16xf32>
    %52 = vector.shape_cast %51 : vector<16xf32> to vector<16x1xf32>
    %cst_24 = arith.constant 1.280000e+02 : f32
    %53 = vector.broadcast %cst_24 : f32 to vector<16x1xf32>
    %54 = arith.divf %52, %53 : vector<16x1xf32>
    %55 = arith.mulf %50, %50 : vector<16x128xf32>
    %cst_25 = arith.constant dense<0.000000e+00> : vector<16xf32>
    %56 = vector.multi_reduction <add>, %55, %cst_25 [1] : vector<16x128xf32> to vector<16xf32>
    %57 = vector.shape_cast %56 : vector<16xf32> to vector<16x1xf32>
    %cst_26 = arith.constant 1.280000e+02 : f32
    %58 = vector.broadcast %cst_26 : f32 to vector<16x1xf32>
    %59 = arith.divf %57, %58 : vector<16x1xf32>
    %60 = arith.mulf %54, %54 : vector<16x1xf32>
    %61 = arith.subf %59, %60 : vector<16x1xf32>
    %cst_27 = arith.constant 0.000000e+00 : f32
    %62 = vector.broadcast %cst_27 : f32 to vector<16x1xf32>
    %63 = arith.maximumf %61, %62 : vector<16x1xf32>
    %64 = vector.broadcast %54 : vector<16x1xf32> to vector<16x128xf32>
    %65 = arith.subf %50, %64 : vector<16x128xf32>
    %cst_28 = arith.constant 9.99999974E-6 : f32
    %66 = vector.broadcast %cst_28 : f32 to vector<16x1xf32>
    %67 = arith.addf %63, %66 : vector<16x1xf32>
    %68 = math.rsqrt %67 : vector<16x1xf32>
    %69 = vector.broadcast %68 : vector<16x1xf32> to vector<16x128xf32>
    %70 = arith.mulf %65, %69 : vector<16x128xf32>
    %71 = vector.broadcast %39 : vector<1x128xf32> to vector<16x128xf32>
    %72 = arith.mulf %70, %71 : vector<16x128xf32>
    %73 = vector.broadcast %40 : vector<1x128xf32> to vector<16x128xf32>
    %74 = arith.addf %72, %73 : vector<16x128xf32>
    %cst_29 = arith.constant 0.000000e+00 : f32
    %75 = vector.broadcast %cst_29 : f32 to vector<16x128xf32>
    %76 = arith.maximumf %74, %75 : vector<16x128xf32>
    %77 = arith.truncf %76 : vector<16x128xf32> to vector<16x128xbf16>
    %cst_30 = arith.constant dense<0.000000e+00> : vector<16x128xf32>
    %78 = tpu.matmul %77, %47, %cst_30 {dimension_numbers = #tpu.dot_dimension_numbers<[1], [0], [0], [1], [0, 0, 1, 1], [], []>} : vector<16x128xbf16>, vector<128x128xbf16>, vector<16x128xf32> -> vector<16x128xf32>
    %79 = vector.broadcast %41 : vector<1x128xf32> to vector<16x128xf32>
    %80 = arith.addf %78, %79 : vector<16x128xf32>
    %cst_31 = arith.constant dense<0.000000e+00> : vector<16xf32>
    %81 = vector.multi_reduction <add>, %80, %cst_31 [1] : vector<16x128xf32> to vector<16xf32>
    %82 = vector.shape_cast %81 : vector<16xf32> to vector<16x1xf32>
    %cst_32 = arith.constant 1.280000e+02 : f32
    %83 = vector.broadcast %cst_32 : f32 to vector<16x1xf32>
    %84 = arith.divf %82, %83 : vector<16x1xf32>
    %85 = arith.mulf %80, %80 : vector<16x128xf32>
    %cst_33 = arith.constant dense<0.000000e+00> : vector<16xf32>
    %86 = vector.multi_reduction <add>, %85, %cst_33 [1] : vector<16x128xf32> to vector<16xf32>
    %87 = vector.shape_cast %86 : vector<16xf32> to vector<16x1xf32>
    %cst_34 = arith.constant 1.280000e+02 : f32
    %88 = vector.broadcast %cst_34 : f32 to vector<16x1xf32>
    %89 = arith.divf %87, %88 : vector<16x1xf32>
    %90 = arith.mulf %84, %84 : vector<16x1xf32>
    %91 = arith.subf %89, %90 : vector<16x1xf32>
    %cst_35 = arith.constant 0.000000e+00 : f32
    %92 = vector.broadcast %cst_35 : f32 to vector<16x1xf32>
    %93 = arith.maximumf %91, %92 : vector<16x1xf32>
    %94 = vector.broadcast %84 : vector<16x1xf32> to vector<16x128xf32>
    %95 = arith.subf %80, %94 : vector<16x128xf32>
    %cst_36 = arith.constant 9.99999974E-6 : f32
    %96 = vector.broadcast %cst_36 : f32 to vector<16x1xf32>
    %97 = arith.addf %93, %96 : vector<16x1xf32>
    %98 = math.rsqrt %97 : vector<16x1xf32>
    %99 = vector.broadcast %98 : vector<16x1xf32> to vector<16x128xf32>
    %100 = arith.mulf %95, %99 : vector<16x128xf32>
    %101 = vector.broadcast %42 : vector<1x128xf32> to vector<16x128xf32>
    %102 = arith.mulf %100, %101 : vector<16x128xf32>
    %103 = vector.broadcast %43 : vector<1x128xf32> to vector<16x128xf32>
    %104 = arith.addf %102, %103 : vector<16x128xf32>
    %105 = arith.extf %35 : vector<16x128xbf16> to vector<16x128xf32>
    %106 = arith.addf %104, %105 : vector<16x128xf32>
    %cst_37 = arith.constant 0.000000e+00 : f32
    %107 = vector.broadcast %cst_37 : f32 to vector<16x128xf32>
    %108 = arith.maximumf %106, %107 : vector<16x128xf32>
    %109 = arith.truncf %108 : vector<16x128xf32> to vector<16x128xbf16>
    %c1_38 = arith.constant 1 : index
    %c0_39 = arith.constant 0 : index
    %c0_40 = arith.constant 0 : index
    %110 = vector.load %arg5[%c1_38, %c0_39, %c0_40] : memref<2x6x128xf32, #tpu.memory_space<vmem>>, vector<1x6x128xf32>
    %111 = vector.shape_cast %110 : vector<1x6x128xf32> to vector<6x128xf32>
    %112 = vector.extract_strided_slice %111 {offsets = [0, 0], sizes = [1, 128], strides = [1, 1]} : vector<6x128xf32> to vector<1x128xf32>
    %113 = vector.extract_strided_slice %111 {offsets = [1, 0], sizes = [1, 128], strides = [1, 1]} : vector<6x128xf32> to vector<1x128xf32>
    %114 = vector.extract_strided_slice %111 {offsets = [2, 0], sizes = [1, 128], strides = [1, 1]} : vector<6x128xf32> to vector<1x128xf32>
    %115 = vector.extract_strided_slice %111 {offsets = [3, 0], sizes = [1, 128], strides = [1, 1]} : vector<6x128xf32> to vector<1x128xf32>
    %116 = vector.extract_strided_slice %111 {offsets = [4, 0], sizes = [1, 128], strides = [1, 1]} : vector<6x128xf32> to vector<1x128xf32>
    %117 = vector.extract_strided_slice %111 {offsets = [5, 0], sizes = [1, 128], strides = [1, 1]} : vector<6x128xf32> to vector<1x128xf32>
    %c1_41 = arith.constant 1 : index
    %c0_42 = arith.constant 0 : index
    %c0_43 = arith.constant 0 : index
    %c0_44 = arith.constant 0 : index
    %118 = vector.load %arg4[%c1_41, %c0_42, %c0_43, %c0_44] : memref<2x2x128x128xbf16, #tpu.memory_space<vmem>>, vector<1x1x128x128xbf16>
    %119 = vector.shape_cast %118 : vector<1x1x128x128xbf16> to vector<128x128xbf16>
    %c1_45 = arith.constant 1 : index
    %c1_46 = arith.constant 1 : index
    %c0_47 = arith.constant 0 : index
    %c0_48 = arith.constant 0 : index
    %120 = vector.load %arg4[%c1_45, %c1_46, %c0_47, %c0_48] : memref<2x2x128x128xbf16, #tpu.memory_space<vmem>>, vector<1x1x128x128xbf16>
    %121 = vector.shape_cast %120 : vector<1x1x128x128xbf16> to vector<128x128xbf16>
    %cst_49 = arith.constant dense<0.000000e+00> : vector<16x128xf32>
    %122 = tpu.matmul %109, %119, %cst_49 {dimension_numbers = #tpu.dot_dimension_numbers<[1], [0], [0], [1], [0, 0, 1, 1], [], []>} : vector<16x128xbf16>, vector<128x128xbf16>, vector<16x128xf32> -> vector<16x128xf32>
    %123 = vector.broadcast %112 : vector<1x128xf32> to vector<16x128xf32>
    %124 = arith.addf %122, %123 : vector<16x128xf32>
    %cst_50 = arith.constant dense<0.000000e+00> : vector<16xf32>
    %125 = vector.multi_reduction <add>, %124, %cst_50 [1] : vector<16x128xf32> to vector<16xf32>
    %126 = vector.shape_cast %125 : vector<16xf32> to vector<16x1xf32>
    %cst_51 = arith.constant 1.280000e+02 : f32
    %127 = vector.broadcast %cst_51 : f32 to vector<16x1xf32>
    %128 = arith.divf %126, %127 : vector<16x1xf32>
    %129 = arith.mulf %124, %124 : vector<16x128xf32>
    %cst_52 = arith.constant dense<0.000000e+00> : vector<16xf32>
    %130 = vector.multi_reduction <add>, %129, %cst_52 [1] : vector<16x128xf32> to vector<16xf32>
    %131 = vector.shape_cast %130 : vector<16xf32> to vector<16x1xf32>
    %cst_53 = arith.constant 1.280000e+02 : f32
    %132 = vector.broadcast %cst_53 : f32 to vector<16x1xf32>
    %133 = arith.divf %131, %132 : vector<16x1xf32>
    %134 = arith.mulf %128, %128 : vector<16x1xf32>
    %135 = arith.subf %133, %134 : vector<16x1xf32>
    %cst_54 = arith.constant 0.000000e+00 : f32
    %136 = vector.broadcast %cst_54 : f32 to vector<16x1xf32>
    %137 = arith.maximumf %135, %136 : vector<16x1xf32>
    %138 = vector.broadcast %128 : vector<16x1xf32> to vector<16x128xf32>
    %139 = arith.subf %124, %138 : vector<16x128xf32>
    %cst_55 = arith.constant 9.99999974E-6 : f32
    %140 = vector.broadcast %cst_55 : f32 to vector<16x1xf32>
    %141 = arith.addf %137, %140 : vector<16x1xf32>
    %142 = math.rsqrt %141 : vector<16x1xf32>
    %143 = vector.broadcast %142 : vector<16x1xf32> to vector<16x128xf32>
    %144 = arith.mulf %139, %143 : vector<16x128xf32>
    %145 = vector.broadcast %113 : vector<1x128xf32> to vector<16x128xf32>
    %146 = arith.mulf %144, %145 : vector<16x128xf32>
    %147 = vector.broadcast %114 : vector<1x128xf32> to vector<16x128xf32>
    %148 = arith.addf %146, %147 : vector<16x128xf32>
    %cst_56 = arith.constant 0.000000e+00 : f32
    %149 = vector.broadcast %cst_56 : f32 to vector<16x128xf32>
    %150 = arith.maximumf %148, %149 : vector<16x128xf32>
    %151 = arith.truncf %150 : vector<16x128xf32> to vector<16x128xbf16>
    %cst_57 = arith.constant dense<0.000000e+00> : vector<16x128xf32>
    %152 = tpu.matmul %151, %121, %cst_57 {dimension_numbers = #tpu.dot_dimension_numbers<[1], [0], [0], [1], [0, 0, 1, 1], [], []>} : vector<16x128xbf16>, vector<128x128xbf16>, vector<16x128xf32> -> vector<16x128xf32>
    %153 = vector.broadcast %115 : vector<1x128xf32> to vector<16x128xf32>
    %154 = arith.addf %152, %153 : vector<16x128xf32>
    %cst_58 = arith.constant dense<0.000000e+00> : vector<16xf32>
    %155 = vector.multi_reduction <add>, %154, %cst_58 [1] : vector<16x128xf32> to vector<16xf32>
    %156 = vector.shape_cast %155 : vector<16xf32> to vector<16x1xf32>
    %cst_59 = arith.constant 1.280000e+02 : f32
    %157 = vector.broadcast %cst_59 : f32 to vector<16x1xf32>
    %158 = arith.divf %156, %157 : vector<16x1xf32>
    %159 = arith.mulf %154, %154 : vector<16x128xf32>
    %cst_60 = arith.constant dense<0.000000e+00> : vector<16xf32>
    %160 = vector.multi_reduction <add>, %159, %cst_60 [1] : vector<16x128xf32> to vector<16xf32>
    %161 = vector.shape_cast %160 : vector<16xf32> to vector<16x1xf32>
    %cst_61 = arith.constant 1.280000e+02 : f32
    %162 = vector.broadcast %cst_61 : f32 to vector<16x1xf32>
    %163 = arith.divf %161, %162 : vector<16x1xf32>
    %164 = arith.mulf %158, %158 : vector<16x1xf32>
    %165 = arith.subf %163, %164 : vector<16x1xf32>
    %cst_62 = arith.constant 0.000000e+00 : f32
    %166 = vector.broadcast %cst_62 : f32 to vector<16x1xf32>
    %167 = arith.maximumf %165, %166 : vector<16x1xf32>
    %168 = vector.broadcast %158 : vector<16x1xf32> to vector<16x128xf32>
    %169 = arith.subf %154, %168 : vector<16x128xf32>
    %cst_63 = arith.constant 9.99999974E-6 : f32
    %170 = vector.broadcast %cst_63 : f32 to vector<16x1xf32>
    %171 = arith.addf %167, %170 : vector<16x1xf32>
    %172 = math.rsqrt %171 : vector<16x1xf32>
    %173 = vector.broadcast %172 : vector<16x1xf32> to vector<16x128xf32>
    %174 = arith.mulf %169, %173 : vector<16x128xf32>
    %175 = vector.broadcast %116 : vector<1x128xf32> to vector<16x128xf32>
    %176 = arith.mulf %174, %175 : vector<16x128xf32>
    %177 = vector.broadcast %117 : vector<1x128xf32> to vector<16x128xf32>
    %178 = arith.addf %176, %177 : vector<16x128xf32>
    %179 = arith.extf %109 : vector<16x128xbf16> to vector<16x128xf32>
    %180 = arith.addf %178, %179 : vector<16x128xf32>
    %cst_64 = arith.constant 0.000000e+00 : f32
    %181 = vector.broadcast %cst_64 : f32 to vector<16x128xf32>
    %182 = arith.maximumf %180, %181 : vector<16x128xf32>
    %183 = arith.truncf %182 : vector<16x128xf32> to vector<16x128xbf16>
    %184 = arith.extf %183 : vector<16x128xbf16> to vector<16x128xf32>
    %c0_65 = arith.constant 0 : index
    %c0_66 = arith.constant 0 : index
    %185 = vector.load %arg6[%c0_65, %c0_66] : memref<16x128xf32, #tpu.memory_space<vmem>>, vector<16x128xf32>
    tpu.vector_store %arg6[%c0_65, %c0_66], %184 {strides = array<i32>} : memref<16x128xf32, #tpu.memory_space<vmem>>, vector<16x128xf32>,
    return
  }
  func.func @transform_0(%arg0: i32) -> (i32, i32) {
    %c0_i32 = arith.constant 0 : i32
    %c0_i32_0 = arith.constant 0 : i32
    return %arg0, %c0_i32 : i32, i32
  }
  func.func @transform_1(%arg0: i32) -> (i32, i32) {
    %c0_i32 = arith.constant 0 : i32
    %c0_i32_0 = arith.constant 0 : i32
    %c0_i32_1 = arith.constant 0 : i32
    return %c0_i32, %c0_i32_0 : i32, i32
  }
  func.func @transform_2(%arg0: i32) -> (i32, i32) {
    %c0_i32 = arith.constant 0 : i32
    %c0_i32_0 = arith.constant 0 : i32
    %c0_i32_1 = arith.constant 0 : i32
    return %c0_i32, %c0_i32_0 : i32, i32
  }
  func.func @transform_3(%arg0: i32) -> (i32, i32, i32, i32) {
    %c0_i32 = arith.constant 0 : i32
    %c0_i32_0 = arith.constant 0 : i32
    %c0_i32_1 = arith.constant 0 : i32
    %c0_i32_2 = arith.constant 0 : i32
    %c0_i32_3 = arith.constant 0 : i32
    return %c0_i32, %c0_i32_0, %c0_i32_1, %c0_i32_2 : i32, i32, i32, i32
  }
  func.func @transform_4(%arg0: i32) -> (i32, i32, i32) {
    %c0_i32 = arith.constant 0 : i32
    %c0_i32_0 = arith.constant 0 : i32
    %c0_i32_1 = arith.constant 0 : i32
    %c0_i32_2 = arith.constant 0 : i32
    return %c0_i32, %c0_i32_0, %c0_i32_1 : i32, i32, i32
  }
  func.func @transform_5(%arg0: i32) -> (i32, i32) {
    %c0_i32 = arith.constant 0 : i32
    %c0_i32_0 = arith.constant 0 : i32
    return %arg0, %c0_i32 : i32, i32
  }
}

</mosaic_0001>

<bundles_post_ra>
// kernel: backbone_forward.1
= control target key start
LH: loop header
LB: loop body
LE: loop exit
PB: predicated region body
PF: predicated region fallthrough
CT: control target
= control target key end

     0   :  { %10 = vsyncpa [#allocation3], 0  ;;  %s1268_s0 = inlined_call_operand.vmem [shape: bf16[16,64], index: 0, kind: input, shape index: {}]   ;;  %s1269_s1 = inlined_call_operand.vmem [shape: bf16[64,128], index: 1, kind: input, shape index: {}]   ;;  %s1270_s2 = inlined_call_operand.vmem [shape: f32[3,128], index: 2, kind: input, shape index: {}]   ;;  %s1271_s3 = inlined_call_operand.hbm [shape: bf16[2,2,128,128], index: 3, kind: input, shape index: {}]   ;;  %s1272_s4 = inlined_call_operand.vmem [shape: f32[2,6,128], index: 4, kind: input, shape index: {}]   ;;  %s1273_s5 = inlined_call_operand.hbm [shape: f32[16,128], index: 5, kind: output, shape index: {}]  }
   0x1   :  { %11 = vsyncpa [#allocation4], 0  ;;  %s1093_s18 = smov [#allocation2]  }
   0x2   :  { %s23_s19 = sshll.u32 %s1093_s18, 4  ;;  %s24_s19 = int_to_ptr.vmem [resolvable:$true] %s23_s19 }
   0x3   :  { %s1057_s20 = scalar_lea.vmem %s24_s19, 4096  ;;  %p1062_p1 = scmp.lt.s32.totalorder %s24_s19, %s24_s19 }
   0x4   :  { %p1058_p0 = scmp.ne.s32.totalorder %s24_s19, %s1057_s20  ;;  %p1063_p2 = scmp.lt.s32.totalorder %s1057_s20, %s1057_s20 }
   0x6   :  { %p1064_p3 = por %p1063_p2, %p1062_p1 }
   0x8   :  { %p1065_p4 = pnand %p1064_p3, %p1058_p0 }
   0xa   :  { %1068 = shalt.err (!%p1065_p4)
}
   0xb   :  { %s1094_s21 = smov 64   ;;  %s1095_s22 = smov 4  }
   0xc   :  { %29 = dma.hbm_to_vmem [thread:$0]  %s1271_s3, 4096, %s24_s19, [#allocation3], %s1094_s21, %s1094_s21, %s1095_s22  }
   0xd   :  { %1089 = dma.done.wait [#allocation3], 4096  }
   0xe   :  { %1090 = vsyncadd [#allocation3], 4294963200  ;;  %v1096_v0 = vmov 0.0   ;;  %vm1097_vm0 = vmmov 0   ;;  %v992_v1 = vld [vmem:[%s1269_s1 + $0x18] sm:$0xff]   ;;  %v993_v2 = vld [vmem:[%s1269_s1 + $0x10] sm:$0xff]   ;;  %v47_v6 = vlaneseq }
   0xf   :  { %892 = vmatprep.subr.bf16.mxu0 %v1096_v0  ;;  %900 = vmatprep.mubr.msk.bf16.mxu0 %vm1097_vm0, %v1096_v0  ;;  %v994_v3 = vld [vmem:[%s1269_s1 + $0x8] sm:$0xff]   ;;  %vm80_vm1 = vcmask 523264   ;;  %v995_v4 = vld [vmem:[%s1269_s1] sm:$0xff]   ;;  %v997_v19 = vld [vmem:[#allocation2 + $0x38] sm:$0xff]  }
  0x10   :  { %904 = vmatprep.subr.bf16.mxu1 %v1096_v0  ;;  %920 = vmatprep.mubr.msk.bf16.mxu1 %vm1097_vm0, %v1096_v0  ;;  %v996_v5 = vld [vmem:[%s1268_s0] sm:$0xff]   ;;  %v1161_v7 = vshrl.u32 %v47_v6, 7  ;;  %v998_v20 = vld [vmem:[#allocation2 + $0x30] sm:$0xff]   ;;  %v999_v21 = vld [vmem:[#allocation2 + $0x28] sm:$0xff]  }
  0x11   :  { %893 = vmatpush3.bf16.msra.mxu0 %v992_v1  ;;  %v36_v9 = vld [vmem:[%s1270_s2] sm:$0x7]  ;;  %905 = vmatpush3.bf16.msra.mxu1 %v997_v19  ;;  %v1001_v23 = vld [vmem:[#allocation2 + $0x18] sm:$0xff]   ;;  %v1002_v24 = vld [vmem:[#allocation2 + $0x10] sm:$0xff]  }
  0x12   :  { %894 = vmatprep.subr.bf16.mxu0 %v1096_v0  ;;  %v1164_v8 = vsub.s32 0, %v1161_v7  ;;  %906 = vmatprep.subr.bf16.mxu1 %v1096_v0  ;;  %v1000_v22 = vld [vmem:[#allocation2 + $0x20] sm:$0xff]   ;;  %v1003_v25 = vld [vmem:[#allocation2 + $0x8] sm:$0xff]   ;;  %v1179_v43 = vsub.s32 1, %v1161_v7  ;;  %v1183_v45 = vsub.s32 2, %v1161_v7 }
  0x13   :  { %v1004_v26 = vld [vmem:[#allocation2] sm:$0xff]  }
  0x14   :  { %v50_v10 = vrot.slane %v36_v9, %v1164_v8  ;;  %v157_v44 = vrot.slane %v36_v9, %v1179_v43  ;;  %v163_v49 = vrot.slane %v36_v9, %v1183_v45  ;;  %v1194_v60 = vld [vmem:[%s1272_s4] sm:$0x3f]  ;;  %v1005_v9 = vld [vmem:[#allocation2 + $0x78] sm:$0xff]  }
  0x15   :  { %895 = vmatpush3.bf16.msra.mxu0 %v993_v2  ;;  %907 = vmatpush3.bf16.msra.mxu1 %v998_v20  ;;  %v206_v61 = vrot.slane %v1194_v60, %v1164_v8 }
  0x16   :  { %896 = vmatprep.subr.bf16.mxu0 %v1096_v0  ;;  %908 = vmatprep.subr.bf16.mxu1 %v1096_v0 }
  0x19   :  { %897 = vmatpush3.bf16.msra.mxu0 %v994_v3  ;;  %909 = vmatpush3.bf16.msra.mxu1 %v999_v21 }
  0x1a   :  { %898 = vmatprep.subr.bf16.mxu0 %v1096_v0  ;;  %910 = vmatprep.subr.bf16.mxu1 %v1096_v0 }
  0x1d   :  { %899 = vmatpush3.bf16.msra.mxu0 %v995_v4  ;;  %911 = vmatpush3.bf16.msra.mxu1 %v1000_v22 }
  0x1e   :  { %924 = vmatprep.subr.bf16.mxu0 %v1096_v0  ;;  %912 = vmatprep.subr.bf16.mxu1 %v1096_v0 }
  0x20   :  { %901 = vmatmul.mubr.msk.bf16.vlgmr.msra.gmra.mxu0 %vm80_vm1, %v996_v5 }
  0x21   :  { %940 = vmatprep.mubr.msk.bf16.mxu0 %vm1097_vm0, %v1096_v0  ;;  %913 = vmatpush3.bf16.msra.mxu1 %v1001_v23 }
  0x22   :  { %914 = vmatprep.subr.bf16.mxu1 %v1096_v0  ;;  %925 = vmatpush3.bf16.msra.mxu0 %v1005_v9 }
  0x23   :  { %926 = vmatprep.subr.bf16.mxu0 %v1096_v0 }
  0x25   :  { %915 = vmatpush3.bf16.msra.mxu1 %v1002_v24 }
  0x26   :  { %916 = vmatprep.subr.bf16.mxu1 %v1096_v0 }
  0x29   :  { %917 = vmatpush3.bf16.msra.mxu1 %v1003_v25 }
  0x2a   :  { %918 = vmatprep.subr.bf16.mxu1 %v1096_v0 }
  0x2d   :  { %919 = vmatpush3.bf16.msra.mxu1 %v1004_v26 }
  0x2e   :  { %944 = vmatprep.subr.bf16.mxu1 %v1096_v0 }
  0xe0   :  { %v118_v11 = vpop.f32.mrf.mxu0 }
  0xe1   :  { %v119_v12 = vadd.f32 %v118_v11, %v50_v10  ;;  %v1007_v11 = vld [vmem:[#allocation2 + $0x68] sm:$0xff]  }
  0xe2   :  { %v902_v13 = vpop.f32.mrf.mxu0 }
  0xe3   :  { %125 = vadd.xlane.f32.xlu0 %v119_v12  ;;  %v132_v14 = vmul.f32 %v119_v12, %v119_v12  ;;  %v1009_v13 = vld [vmem:[#allocation2 + $0x58] sm:$0xff]  }
  0xe4   :  { %v121_v15 = vpop.f32.mrf.mxu0 }
  0xe5   :  { %v122_v16 = vadd.f32 %v121_v15, %v50_v10  ;;  %134 = vadd.xlane.f32.xlu1 %v132_v14  ;;  %v1006_v10 = vld [vmem:[#allocation2 + $0x70] sm:$0xff]   ;;  %v1011_v15 = vld [vmem:[#allocation2 + $0x48] sm:$0xff]  }
  0xe6   :  { %v903_v17 = vpop.f32.mrf.mxu0  ;;  %927 = vmatpush3.bf16.msra.mxu0 %v1006_v10  ;;  %v1010_v14 = vld [vmem:[#allocation2 + $0x50] sm:$0xff]  }
  0xe7   :  { %127 = vadd.xlane.f32.xlu0 %v122_v16  ;;  %v133_v18 = vmul.f32 %v122_v16, %v122_v16  ;;  %928 = vmatprep.subr.bf16.mxu0 %v1096_v0 }
  0xe9   :  { %136 = vadd.xlane.f32.xlu1 %v133_v18 }
  0xea   :  { %929 = vmatpush3.bf16.msra.mxu0 %v1007_v11 }
  0xeb   :  { %930 = vmatprep.subr.bf16.mxu0 %v1096_v0 }
 0x16c   :  { %v126_v27 = vpop.xlane.xlu0 %125 }
 0x16d   :  { %v130_v28 = vmul.f32 0.0078125, %v126_v27 }
 0x16e   :  { %v135_v29 = vpop.xlane.xlu1 %134 }
 0x16f   :  { %v140_v30 = vmul.f32 %v130_v28, %v130_v28  ;;  %v138_v31 = vmul.f32 0.0078125, %v135_v29  ;;  %v146_v46 = vsub.f32 %v119_v12, %v130_v28  ;;  %v1008_v12 = vld [vmem:[#allocation2 + $0x60] sm:$0xff]  }
 0x170   :  { %v128_v32 = vpop.xlane.xlu0 %127  ;;  %931 = vmatpush3.bf16.msra.mxu0 %v1008_v12 }
 0x171   :  { %v142_v33 = vsub.f32 %v138_v31, %v140_v30  ;;  %v131_v34 = vmul.f32 0.0078125, %v128_v32  ;;  %932 = vmatprep.subr.bf16.mxu0 %v1096_v0 }
 0x172   :  { %v137_v35 = vpop.xlane.xlu1 %136 }
 0x173   :  { %v144_v36 = vmax.f32 %v142_v33, 0.0  ;;  %v141_v37 = vmul.f32 %v131_v34, %v131_v34  ;;  %v139_v38 = vmul.f32 0.0078125, %v137_v35  ;;  %v147_v50 = vsub.f32 %v122_v16, %v131_v34  ;;  %v1012_v16 = vld [vmem:[#allocation2 + $0x40] sm:$0xff]  }
 0x174   :  { %933 = vmatpush3.bf16.msra.mxu0 %v1009_v13  ;;  %v327_v34 = vrot.slane %v1194_v60, %v1179_v43 }
 0x175   :  { %v148_v39 = vadd.f32 1e-05, %v144_v36  ;;  %v143_v40 = vsub.f32 %v139_v38, %v141_v37  ;;  %934 = vmatprep.subr.bf16.mxu0 %v1096_v0 }
 0x177   :  { %1029 = vrsqrt.f32 %v148_v39  ;;  %v145_v41 = vmax.f32 %v143_v40, 0.0  ;;  %v333_v39 = vrot.slane %v1194_v60, %v1183_v45 }
 0x178   :  { %935 = vmatpush3.bf16.msra.mxu0 %v1010_v14 }
 0x179   :  { %v149_v42 = vadd.f32 1e-05, %v145_v41  ;;  %936 = vmatprep.subr.bf16.mxu0 %v1096_v0 }
 0x17b   :  { %1031 = vrsqrt.f32 %v149_v42 }
 0x17c   :  { %937 = vmatpush3.bf16.msra.mxu0 %v1011_v15 }
 0x17d   :  { %938 = vmatprep.subr.bf16.mxu0 %v1096_v0 }
 0x180   :  { %939 = vmatpush3.bf16.msra.mxu0 %v1012_v16 }
 0x181   :  { %964 = vmatprep.subr.bf16.mxu0 %v1096_v0 }
 0x184   :  { %v1030_v47 = vpop.eup %1029 }
 0x185   :  { %v152_v48 = vmul.f32 %v1030_v47, %v146_v46 }
 0x187   :  { %v158_v51 = vmul.f32 %v157_v44, %v152_v48 }
 0x188   :  { %v1032_v52 = vpop.eup %1031 }
 0x189   :  { %v153_v53 = vmul.f32 %v1032_v52, %v147_v50  ;;  %v164_v55 = vadd.f32 %v163_v49, %v158_v51  ;;  %v341_v50 = vsub.s32 3, %v1161_v7 }
 0x18b   :  { %v159_v54 = vmul.f32 %v157_v44, %v153_v53  ;;  %v166_v57 = vmax.f32 %v164_v55, 0.0  ;;  %v342_v51 = vrot.slane %v1194_v60, %v341_v50 }
 0x18d   :  { %v165_v56 = vadd.f32 %v163_v49, %v159_v54 }
 0x18f   :  { %v167_v58 = vmax.f32 %v165_v56, 0.0 }
 0x191   :  { %v1186_v59 = vpack.c.bf16 %v167_v58, %v166_v57 }
 0x193   :  { %921 = vmatmul.mubr.bf16.vlgmr.msra.gmra.mxu1 %v1186_v59 }
 0x194   :  { %960 = vmatprep.mubr.msk.bf16.mxu1 %vm1097_vm0, %v1096_v0 }
 0x253   :  { %v289_v62 = vpop.f32.mrf.mxu1 }
 0x254   :  { %v290_v63 = vadd.f32 %v289_v62, %v206_v61  ;;  %v1013_v62 = vld [vmem:[#allocation2 + $0xb8] sm:$0xff]  }
 0x255   :  { %v922_v1 = vpop.f32.mrf.mxu1  ;;  %945 = vmatpush3.bf16.msra.mxu1 %v1013_v62  ;;  %v1025_v62 = vld [vmem:[#allocation2 + $0xd8] sm:$0xff]  }
 0x256   :  { %296 = vadd.xlane.f32.xlu0 %v290_v63  ;;  %v302_v4 = vmul.f32 %v290_v63, %v290_v63  ;;  %946 = vmatprep.subr.bf16.mxu1 %v1096_v0  ;;  %v1015_v1 = vld [vmem:[#allocation2 + $0xa8] sm:$0xff]  }
 0x257   :  { %v292_v2 = vpop.f32.mrf.mxu1 }
 0x258   :  { %v293_v3 = vadd.f32 %v292_v2, %v206_v61  ;;  %v1016_v2 = vld [vmem:[#allocation2 + $0xa0] sm:$0xff]  }
 0x259   :  { %v923_v5 = vpop.f32.mrf.mxu1 }
 0x25a   :  { %304 = vadd.xlane.f32.xlu0 %v302_v4  ;;  %298 = vadd.xlane.f32.xlu1 %v293_v3  ;;  %v303_v6 = vmul.f32 %v293_v3, %v293_v3  ;;  %v1018_v4 = vld [vmem:[#allocation2 + $0x90] sm:$0xff]   ;;  %v1019_v5 = vld [vmem:[#allocation2 + $0x88] sm:$0xff]  }
 0x25e   :  { %306 = vadd.xlane.f32.xlu1 %v303_v6  ;;  %v1020_v6 = vld [vmem:[#allocation2 + $0x80] sm:$0xff]  }
 0x2df   :  { %v297_v17 = vpop.xlane.xlu0 %296 }
 0x2e0   :  { %v300_v18 = vmul.f32 0.0078125, %v297_v17 }
 0x2e2   :  { %v310_v21 = vmul.f32 %v300_v18, %v300_v18  ;;  %v316_v33 = vsub.f32 %v290_v63, %v300_v18  ;;  %v1014_v63 = vld [vmem:[#allocation2 + $0xb0] sm:$0xff]  }
 0x2e3   :  { %v305_v19 = vpop.xlane.xlu0 %304  ;;  %v299_v20 = vpop.xlane.xlu1 %298  ;;  %947 = vmatpush3.bf16.msra.mxu1 %v1014_v63  ;;  %v1026_v63 = vld [vmem:[#allocation2 + $0xd0] sm:$0xff]  }
 0x2e4   :  { %v308_v22 = vmul.f32 0.0078125, %v305_v19  ;;  %v301_v23 = vmul.f32 0.0078125, %v299_v20  ;;  %948 = vmatprep.subr.bf16.mxu1 %v1096_v0 }
 0x2e6   :  { %v312_v24 = vsub.f32 %v308_v22, %v310_v21  ;;  %v311_v27 = vmul.f32 %v301_v23, %v301_v23  ;;  %v317_v37 = vsub.f32 %v293_v3, %v301_v23  ;;  %v1017_v3 = vld [vmem:[#allocation2 + $0x98] sm:$0xff]  }
 0x2e7   :  { %v307_v25 = vpop.xlane.xlu1 %306  ;;  %949 = vmatpush3.bf16.msra.mxu1 %v1015_v1  ;;  %v1027_v1 = vld [vmem:[#allocation2 + $0xc8] sm:$0xff]  }
 0x2e8   :  { %v314_v26 = vmax.f32 %v312_v24, 0.0  ;;  %v309_v28 = vmul.f32 0.0078125, %v307_v25  ;;  %950 = vmatprep.subr.bf16.mxu1 %v1096_v0  ;;  %v462_v25 = vsub.s32 4, %v1161_v7 }
 0x2ea   :  { %v318_v29 = vadd.f32 1e-05, %v314_v26  ;;  %v313_v30 = vsub.f32 %v309_v28, %v311_v27  ;;  %v468_v26 = vsub.s32 5, %v1161_v7  ;;  %v463_v28 = vrot.slane %v1194_v60, %v462_v25 }
 0x2eb   :  { %951 = vmatpush3.bf16.msra.mxu1 %v1016_v2  ;;  %v1028_v2 = vld [vmem:[#allocation2 + $0xc0] sm:$0xff]  }
 0x2ec   :  { %1033 = vrsqrt.f32 %v318_v29  ;;  %v315_v31 = vmax.f32 %v313_v30, 0.0  ;;  %952 = vmatprep.subr.bf16.mxu1 %v1096_v0 }
 0x2ee   :  { %v319_v32 = vadd.f32 1e-05, %v315_v31  ;;  %v469_v31 = vrot.slane %v1194_v60, %v468_v26  ;;  %v1239_v60 = vld [vmem:[%s1272_s4 + $0x8] sm:$0x3f]  ;;  %s1098_s4 = smov [#allocation5]  }
 0x2ef   :  { %953 = vmatpush3.bf16.msra.mxu1 %v1017_v3  ;;  %s800_s12 = sshll.u32 %s1098_s4, 4  ;;  %s801_s12 = int_to_ptr.vmem [resolvable:$true] %s800_s12 }
 0x2f0   :  { %1035 = vrsqrt.f32 %v319_v32  ;;  %954 = vmatprep.subr.bf16.mxu1 %v1096_v0  ;;  %s1069_s13 = scalar_lea.vmem %s801_s12, 256  ;;  %p1074_p6 = scmp.lt.s32.totalorder %s801_s12, %s801_s12 }
 0x2f1   :  { %p1070_p5 = scmp.ne.s32.totalorder %s801_s12, %s1069_s13  ;;  %p1075_p7 = scmp.lt.s32.totalorder %s1069_s13, %s1069_s13 }
 0x2f3   :  { %955 = vmatpush3.bf16.msra.mxu1 %v1018_v4  ;;  %p1076_p8 = por %p1075_p7, %p1074_p6 }
 0x2f4   :  { %956 = vmatprep.subr.bf16.mxu1 %v1096_v0 }
 0x2f5   :  { %p1077_p9 = pnand %p1076_p8, %p1070_p5 }
 0x2f7   :  { %957 = vmatpush3.bf16.msra.mxu1 %v1019_v5 }
 0x2f8   :  { %958 = vmatprep.subr.bf16.mxu1 %v1096_v0 }
 0x2f9   :  { %v1034_v35 = vpop.eup %1033 }
 0x2fa   :  { %v322_v36 = vmul.f32 %v1034_v35, %v316_v33 }
 0x2fb   :  { %959 = vmatpush3.bf16.msra.mxu1 %v1020_v6 }
 0x2fc   :  { %v328_v38 = vmul.f32 %v327_v34, %v322_v36 }
 0x2fd   :  { %v1036_v40 = vpop.eup %1035 }
 0x2fe   :  { %v323_v41 = vmul.f32 %v1036_v40, %v317_v37  ;;  %v334_v44 = vadd.f32 %v333_v39, %v328_v38  ;;  %v472_v37 = vunpack.c.l.bf16 %v1186_v59 }
 0x300   :  { %v329_v42 = vmul.f32 %v327_v34, %v323_v41  ;;  %v336_v47 = vmax.f32 %v334_v44, 0.0 }
 0x302   :  { %v335_v46 = vadd.f32 %v333_v39, %v329_v42  ;;  %v473_v39 = vunpack.c.h.bf16 %v1186_v59 }
 0x304   :  { %v337_v48 = vmax.f32 %v335_v46, 0.0 }
 0x306   :  { %v338_v49 = vpack.c.bf16 %v337_v48, %v336_v47  ;;  %v518_v48 = vrot.slane %v1239_v60, %v1164_v8  ;;  %v1023_v8 = vld [vmem:[#allocation2 + $0xe8] sm:$0xff]  }
 0x308   :  { %941 = vmatmul.mubr.bf16.vlgmr.msra.gmra.mxu0 %v338_v49 }
 0x309   :  { %980 = vmatprep.mubr.msk.bf16.mxu0 %vm1097_vm0, %v1096_v0 }
 0x3c8   :  { %v425_v52 = vpop.f32.mrf.mxu0 }
 0x3c9   :  { %v426_v53 = vadd.f32 %v425_v52, %v342_v51 }
 0x3ca   :  { %v942_v54 = vpop.f32.mrf.mxu0 }
 0x3cb   :  { %432 = vadd.xlane.f32.xlu0 %v426_v53  ;;  %v438_v57 = vmul.f32 %v426_v53, %v426_v53 }
 0x3cc   :  { %v428_v55 = vpop.f32.mrf.mxu0 }
 0x3cd   :  { %v429_v56 = vadd.f32 %v428_v55, %v342_v51 }
 0x3ce   :  { %v943_v58 = vpop.f32.mrf.mxu0 }
 0x3cf   :  { %440 = vadd.xlane.f32.xlu0 %v438_v57  ;;  %434 = vadd.xlane.f32.xlu1 %v429_v56  ;;  %v439_v61 = vmul.f32 %v429_v56, %v429_v56  ;;  %v1021_v57 = vld [vmem:[#allocation2 + $0xf8] sm:$0xff]   ;;  %v1022_v58 = vld [vmem:[#allocation2 + $0xf0] sm:$0xff]  }
 0x3d0   :  { %965 = vmatpush3.bf16.msra.mxu0 %v1021_v57 }
 0x3d1   :  { %966 = vmatprep.subr.bf16.mxu0 %v1096_v0 }
 0x3d3   :  { %442 = vadd.xlane.f32.xlu1 %v439_v61  ;;  %v1024_v61 = vld [vmem:[#allocation2 + $0xe0] sm:$0xff]  }
 0x3d4   :  { %967 = vmatpush3.bf16.msra.mxu0 %v1022_v58 }
 0x3d5   :  { %968 = vmatprep.subr.bf16.mxu0 %v1096_v0 }
 0x3d8   :  { %969 = vmatpush3.bf16.msra.mxu0 %v1023_v8 }
 0x3d9   :  { %970 = vmatprep.subr.bf16.mxu0 %v1096_v0 }
 0x3dc   :  { %971 = vmatpush3.bf16.msra.mxu0 %v1024_v61 }
 0x3dd   :  { %972 = vmatprep.subr.bf16.mxu0 %v1096_v0 }
 0x3e0   :  { %973 = vmatpush3.bf16.msra.mxu0 %v1025_v62 }
 0x3e1   :  { %974 = vmatprep.subr.bf16.mxu0 %v1096_v0 }
 0x3e4   :  { %975 = vmatpush3.bf16.msra.mxu0 %v1026_v63  ;;  %v775_v63 = vrot.slane %v1239_v60, %v462_v25 }
 0x3e5   :  { %976 = vmatprep.subr.bf16.mxu0 %v1096_v0 }
 0x3e8   :  { %977 = vmatpush3.bf16.msra.mxu0 %v1027_v1 }
 0x3e9   :  { %978 = vmatprep.subr.bf16.mxu0 %v1096_v0 }
 0x3ec   :  { %979 = vmatpush3.bf16.msra.mxu0 %v1028_v2 }
 0x454   :  { %v433_v9 = vpop.xlane.xlu0 %432 }
 0x455   :  { %v436_v10 = vmul.f32 0.0078125, %v433_v9 }
 0x457   :  { %v446_v13 = vmul.f32 %v436_v10, %v436_v10  ;;  %v452_v27 = vsub.f32 %v426_v53, %v436_v10 }
 0x458   :  { %v441_v11 = vpop.xlane.xlu0 %440  ;;  %v435_v12 = vpop.xlane.xlu1 %434 }
 0x459   :  { %v444_v14 = vmul.f32 0.0078125, %v441_v11  ;;  %v437_v15 = vmul.f32 0.0078125, %v435_v12 }
 0x45b   :  { %v448_v16 = vsub.f32 %v444_v14, %v446_v13  ;;  %v447_v19 = vmul.f32 %v437_v15, %v437_v15  ;;  %v453_v32 = vsub.f32 %v429_v56, %v437_v15 }
 0x45c   :  { %v443_v17 = vpop.xlane.xlu1 %442 }
 0x45d   :  { %v450_v18 = vmax.f32 %v448_v16, 0.0  ;;  %v445_v20 = vmul.f32 0.0078125, %v443_v17 }
 0x45f   :  { %v454_v21 = vadd.f32 1e-05, %v450_v18  ;;  %v449_v22 = vsub.f32 %v445_v20, %v447_v19 }
 0x461   :  { %1037 = vrsqrt.f32 %v454_v21  ;;  %v451_v23 = vmax.f32 %v449_v22, 0.0  ;;  %v639_v21 = vrot.slane %v1239_v60, %v1179_v43  ;;  %v654_v43 = vrot.slane %v1239_v60, %v341_v50 }
 0x463   :  { %v455_v24 = vadd.f32 1e-05, %v451_v23 }
 0x465   :  { %1039 = vrsqrt.f32 %v455_v24 }
 0x46e   :  { %v1038_v29 = vpop.eup %1037 }
 0x46f   :  { %v458_v30 = vmul.f32 %v1038_v29, %v452_v27 }
 0x471   :  { %v464_v33 = vmul.f32 %v463_v28, %v458_v30 }
 0x472   :  { %v1040_v34 = vpop.eup %1039 }
 0x473   :  { %v459_v35 = vmul.f32 %v1040_v34, %v453_v32  ;;  %v470_v36 = vadd.f32 %v469_v31, %v464_v33 }
 0x475   :  { %v465_v38 = vmul.f32 %v463_v28, %v459_v35  ;;  %v474_v41 = vadd.f32 %v472_v37, %v470_v36  ;;  %v645_v28 = vrot.slane %v1239_v60, %v1183_v45 }
 0x477   :  { %v471_v40 = vadd.f32 %v469_v31, %v465_v38  ;;  %v476_v44 = vmax.f32 %v474_v41, 0.0 }
 0x479   :  { %v475_v42 = vadd.f32 %v473_v39, %v471_v40 }
 0x47b   :  { %v477_v46 = vmax.f32 %v475_v42, 0.0 }
 0x47d   :  { %v1233_v47 = vpack.c.bf16 %v477_v46, %v476_v44 }
 0x47f   :  { %961 = vmatmul.mubr.bf16.vlgmr.msra.gmra.mxu1 %v1233_v47 }
 0x53f   :  { %v601_v49 = vpop.f32.mrf.mxu1 }
 0x540   :  { %v602_v51 = vadd.f32 %v601_v49, %v518_v48 }
 0x541   :  { %v962_v59 = vpop.f32.mrf.mxu1 }
 0x542   :  { %608 = vadd.xlane.f32.xlu0 %v602_v51  ;;  %v614_v54 = vmul.f32 %v602_v51, %v602_v51 }
 0x543   :  { %v604_v52 = vpop.f32.mrf.mxu1 }
 0x544   :  { %v605_v53 = vadd.f32 %v604_v52, %v518_v48 }
 0x545   :  { %v963_v55 = vpop.f32.mrf.mxu1 }
 0x546   :  { %616 = vadd.xlane.f32.xlu0 %v614_v54  ;;  %610 = vadd.xlane.f32.xlu1 %v605_v53  ;;  %v615_v56 = vmul.f32 %v605_v53, %v605_v53 }
 0x54a   :  { %618 = vadd.xlane.f32.xlu1 %v615_v56 }
 0x5cb   :  { %v609_v3 = vpop.xlane.xlu0 %608 }
 0x5cc   :  { %v612_v4 = vmul.f32 0.0078125, %v609_v3 }
 0x5ce   :  { %v622_v9 = vmul.f32 %v612_v4, %v612_v4  ;;  %v628_v0 = vsub.f32 %v602_v51, %v612_v4  ;;  %v781_v4 = vrot.slane %v1239_v60, %v468_v26 }
 0x5cf   :  { %v617_v5 = vpop.xlane.xlu0 %616  ;;  %v611_v6 = vpop.xlane.xlu1 %610 }
 0x5d0   :  { %v620_v10 = vmul.f32 0.0078125, %v617_v5  ;;  %v613_v11 = vmul.f32 0.0078125, %v611_v6 }
 0x5d2   :  { %v624_v12 = vsub.f32 %v620_v10, %v622_v9  ;;  %v623_v15 = vmul.f32 %v613_v11, %v613_v11  ;;  %v629_v24 = vsub.f32 %v605_v53, %v613_v11 }
 0x5d3   :  { %v619_v13 = vpop.xlane.xlu1 %618 }
 0x5d4   :  { %v626_v14 = vmax.f32 %v624_v12, 0.0  ;;  %v621_v16 = vmul.f32 0.0078125, %v619_v13  ;;  %v784_v12 = vunpack.c.l.bf16 %v1233_v47 }
 0x5d6   :  { %v630_v17 = vadd.f32 1e-05, %v626_v14  ;;  %v625_v18 = vsub.f32 %v621_v16, %v623_v15  ;;  %v785_v14 = vunpack.c.h.bf16 %v1233_v47 }
 0x5d8   :  { %1041 = vrsqrt.f32 %v630_v17  ;;  %v627_v19 = vmax.f32 %v625_v18, 0.0 }
 0x5da   :  { %v631_v20 = vadd.f32 1e-05, %v627_v19 }
 0x5dc   :  { %1043 = vrsqrt.f32 %v631_v20 }
 0x5e5   :  { %v1042_v22 = vpop.eup %1041 }
 0x5e6   :  { %v634_v23 = vmul.f32 %v1042_v22, %v628_v0 }
 0x5e8   :  { %v640_v27 = vmul.f32 %v639_v21, %v634_v23 }
 0x5e9   :  { %v1044_v29 = vpop.eup %1043 }
 0x5ea   :  { %v635_v30 = vmul.f32 %v1044_v29, %v629_v24  ;;  %v646_v32 = vadd.f32 %v645_v28, %v640_v27 }
 0x5ec   :  { %v641_v31 = vmul.f32 %v639_v21, %v635_v30  ;;  %v648_v34 = vmax.f32 %v646_v32, 0.0 }
 0x5ee   :  { %v647_v33 = vadd.f32 %v645_v28, %v641_v31 }
 0x5f0   :  { %v649_v35 = vmax.f32 %v647_v33, 0.0 }
 0x5f2   :  { %v650_v36 = vpack.c.bf16 %v649_v35, %v648_v34 }
 0x5f4   :  { %981 = vmatmul.mubr.bf16.vlgmr.msra.gmra.mxu0 %v650_v36 }
 0x6b4   :  { %v737_v37 = vpop.f32.mrf.mxu0 }
 0x6b5   :  { %v738_v38 = vadd.f32 %v737_v37, %v654_v43 }
 0x6b6   :  { %v982_v39 = vpop.f32.mrf.mxu0 }
 0x6b7   :  { %744 = vadd.xlane.f32.xlu0 %v738_v38  ;;  %v750_v45 = vmul.f32 %v738_v38, %v738_v38 }
 0x6b8   :  { %v740_v40 = vpop.f32.mrf.mxu0 }
 0x6b9   :  { %v741_v41 = vadd.f32 %v740_v40, %v654_v43 }
 0x6ba   :  { %v983_v42 = vpop.f32.mrf.mxu0 }
 0x6bb   :  { %752 = vadd.xlane.f32.xlu0 %v750_v45  ;;  %746 = vadd.xlane.f32.xlu1 %v741_v41  ;;  %v751_v44 = vmul.f32 %v741_v41, %v741_v41 }
 0x6bf   :  { %754 = vadd.xlane.f32.xlu1 %v751_v44 }
 0x740   :  { %v745_v46 = vpop.xlane.xlu0 %744 }
 0x741   :  { %v748_v48 = vmul.f32 0.0078125, %v745_v46 }
 0x743   :  { %v758_v59 = vmul.f32 %v748_v48, %v748_v48  ;;  %v764_v1 = vsub.f32 %v738_v38, %v748_v48 }
 0x744   :  { %v753_v49 = vpop.xlane.xlu0 %752  ;;  %v747_v51 = vpop.xlane.xlu1 %746 }
 0x745   :  { %v756_v52 = vmul.f32 0.0078125, %v753_v49  ;;  %v749_v53 = vmul.f32 0.0078125, %v747_v51 }
 0x747   :  { %v760_v50 = vsub.f32 %v756_v52, %v758_v59  ;;  %v759_v56 = vmul.f32 %v749_v53, %v749_v53  ;;  %v765_v5 = vsub.f32 %v741_v41, %v749_v53 }
 0x748   :  { %v755_v54 = vpop.xlane.xlu1 %754 }
 0x749   :  { %v762_v55 = vmax.f32 %v760_v50, 0.0  ;;  %v757_v57 = vmul.f32 0.0078125, %v755_v54 }
 0x74b   :  { %v766_v58 = vadd.f32 1e-05, %v762_v55  ;;  %v761_v8 = vsub.f32 %v757_v57, %v759_v56 }
 0x74d   :  { %1045 = vrsqrt.f32 %v766_v58  ;;  %v763_v61 = vmax.f32 %v761_v8, 0.0 }
 0x74f   :  { %v767_v62 = vadd.f32 1e-05, %v763_v61 }
 0x751   :  { %1047 = vrsqrt.f32 %v767_v62 }
 0x75a   :  { %v1046_v2 = vpop.eup %1045 }
 0x75b   :  { %v770_v3 = vmul.f32 %v1046_v2, %v764_v1 }
 0x75d   :  { %v776_v6 = vmul.f32 %v775_v63, %v770_v3 }
 0x75e   :  { %v1048_v9 = vpop.eup %1047 }
 0x75f   :  { %v771_v10 = vmul.f32 %v1048_v9, %v765_v5  ;;  %v782_v11 = vadd.f32 %v781_v4, %v776_v6 }
 0x761   :  { %v777_v13 = vmul.f32 %v775_v63, %v771_v10  ;;  %v786_v16 = vadd.f32 %v784_v12, %v782_v11 }
 0x763   :  { %v783_v15 = vadd.f32 %v781_v4, %v777_v13  ;;  %v788_v17 = vmax.f32 %v786_v16, 0.0 }
 0x765   :  { %v787_v25 = vadd.f32 %v785_v14, %v783_v15 }
 0x767   :  { %v789_v18 = vmax.f32 %v787_v25, 0.0 }
 0x769   :  { %v790_v7 = vpack.c.bf16 %v789_v18, %v788_v17 }
 0x76b   :  { %v791_v26 = vunpack.c.l.bf16 %v790_v7  ;;  %v792_v60 = vunpack.c.h.bf16 %v790_v7 }
 0x76d   :  { %793 = vst [vmem:[#allocation5] sm:$0xff] %v791_v26  ;;  %794 = vst [vmem:[#allocation5 + $0x8] sm:$0xff] %v792_v60 }
 0x76e   :  { %1080 = shalt.err (!%p1077_p9)
}
 0x76f   :  { %s1099_s14 = smov 128   ;;  %s1100_s15 = smov 8  }
 0x770   :  { %806 = dma.vmem_to_hbm [thread:$0]  %s801_s12, 256, %s1273_s5, [#allocation4], %s1099_s14, %s1099_s14, %s1100_s15  }
 0x771   :  { %1091 = dma.done.wait [#allocation4], 256  }
 0x772   :  { %1092 = vsyncadd [#allocation4], 4294967040 }
 0x773   :  { %810 = vsyncpa [#allocation3], 1 }
 0x774   :  { %811 = vsyncpa [#allocation4], 1 }

</bundles_post_ra>
